<compile_context>
chip_gen: v7x
topology: tpu7x:2x2x1
jax: 0.10.0
libtpu: 0.0.40
codegen_flags: <defaults>
</compile_context>

<pallas_src>
import jax
import jax.numpy as jnp
from jax.experimental import pallas as pl
from jax.experimental.pallas import tpu as pltpu

LANE = 128
SUBLANE = 8


def _round_up(x, m):
    return (x + m - 1) // m * m


def _vmem_capacity_bytes():
    try:
        return int(pltpu.get_tpu_info().vmem_capacity_bytes)
    except Exception:
        return 64 * 1024 * 1024  # conservative fallback (v7x per-TC VMEM)


def _pad2(a, rows, cols, dtype):
    """Zero-pad/cast to (rows, cols, dtype); no-op copy if already matching."""
    if a.shape == (rows, cols) and a.dtype == jnp.dtype(dtype):
        return a
    out = jnp.zeros((rows, cols), dtype)
    return out.at[: a.shape[0], : a.shape[1]].set(a.astype(dtype))


def _elu(h):
    # ELU(alpha=1) in f32; clamp exp argument so the untaken branch stays finite.
    return jnp.where(h > 0, h, jnp.exp(jnp.minimum(h, 0.0)) - 1.0)


# --------------------------------------------------------------------------- #
# Fused single-kernel path (whole padded problem resident in VMEM).
# --------------------------------------------------------------------------- #
def gcn_fused_kernel(ahat_ref, x_ref, w1_ref, b1_ref, w2_ref, b2_ref, out_ref):
    ahat = ahat_ref[...]                                            # bf16
    # Layer 1 (re-associated): (Ahat @ X) @ W1 + b1, then ELU.
    ax = jnp.dot(ahat, x_ref[...], preferred_element_type=jnp.float32)
    h = jnp.dot(ax.astype(jnp.bfloat16), w1_ref[...],
                preferred_element_type=jnp.float32) + b1_ref[...]
    h = _elu(h)
    # Layer 2: (Ahat @ H) @ W2 + b2 -- Ahat reused from VMEM (read once).
    ah = jnp.dot(ahat, h.astype(jnp.bfloat16),
                 preferred_element_type=jnp.float32)
    out_ref[...] = jnp.dot(ah.astype(jnp.bfloat16), w2_ref[...],
                           preferred_element_type=jnp.float32) + b2_ref[...]


# --------------------------------------------------------------------------- #
# K-tiled two-kernel path (VMEM footprint independent of N).
# --------------------------------------------------------------------------- #
def gcn_layer1_tiled_kernel(ahat_ref, x_ref, w1_ref, b1_ref, h_ref, acc_ref):
    k = pl.program_id(1)

    @pl.when(k == 0)
    def _():
        acc_ref[...] = jnp.zeros_like(acc_ref)

    acc_ref[...] += jnp.dot(ahat_ref[...], x_ref[...],
                            preferred_element_type=jnp.float32)

    @pl.when(k == pl.num_programs(1) - 1)
    def _():
        h = jnp.dot(acc_ref[...].astype(jnp.bfloat16), w1_ref[...],
                    preferred_element_type=jnp.float32) + b1_ref[...]
        # bf16 only at the store: this buffer feeds the layer-2 MXU dot.
        h_ref[...] = _elu(h).astype(h_ref.dtype)


def gcn_layer2_tiled_kernel(ahat_ref, h_ref, w2_ref, b2_ref, out_ref, acc_ref):
    k = pl.program_id(1)

    @pl.when(k == 0)
    def _():
        acc_ref[...] = jnp.zeros_like(acc_ref)

    acc_ref[...] += jnp.dot(ahat_ref[...], h_ref[...],
                            preferred_element_type=jnp.float32)

    @pl.when(k == pl.num_programs(1) - 1)
    def _():
        out_ref[...] = jnp.dot(acc_ref[...].astype(jnp.bfloat16), w2_ref[...],
                               preferred_element_type=jnp.float32) + b2_ref[...]


# --------------------------------------------------------------------------- #
# Wrapper
# --------------------------------------------------------------------------- #
def gcn_forward(ahat, x, w1, b1, w2, b2, *, fused=None, row_tile=512):
    """Two-layer GCN forward. `ahat` may already be the padded bf16 matrix."""
    n, f = x.shape
    hdim = w1.shape[1]
    c = w2.shape[1]

    fp = _round_up(f, LANE)
    hp = _round_up(hdim, LANE)
    cp = _round_up(c, LANE)

    cap = _vmem_capacity_bytes()

    # Decide fused (single kernel) vs K-tiled based on fused-path VMEM need.
    n_fused = _round_up(n, SUBLANE)
    fused_bytes = (2 * n_fused * n_fused                    # Ahat bf16
                   + 2 * n_fused * fp                       # X bf16
                   + 2 * fp * hp + 2 * hp * cp              # weights bf16
                   + 4 * (hp + cp)                          # biases f32
                   + 4 * n_fused * cp                       # output f32
                   + 4 * n_fused * (fp + 2 * hp + cp))      # in-kernel temps
    if fused is None:
        fused = fused_bytes <= int(0.4 * cap)

    w1_p = _pad2(w1, fp, hp, jnp.bfloat16)
    w2_p = _pad2(w2, hp, cp, jnp.bfloat16)
    b1_p = _pad2(b1.reshape(1, -1), 1, hp, jnp.float32)
    b2_p = _pad2(b2.reshape(1, -1), 1, cp, jnp.float32)

    if fused:
        n_pad = n_fused
        ahat_p = _pad2(ahat, n_pad, n_pad, jnp.bfloat16)
        x_p = _pad2(x, n_pad, fp, jnp.bfloat16)

        vmem_limit = int(min(cap, max(2 * fused_bytes, 32 * 1024 * 1024)))
        out = pl.pallas_call(
            gcn_fused_kernel,
            out_shape=jax.ShapeDtypeStruct((n_pad, cp), jnp.float32),
            grid=(1,),
            in_specs=[
                pl.BlockSpec((n_pad, n_pad), lambda i: (0, 0)),   # Ahat
                pl.BlockSpec((n_pad, fp), lambda i: (0, 0)),      # X
                pl.BlockSpec((fp, hp), lambda i: (0, 0)),         # W1
                pl.BlockSpec((1, hp), lambda i: (0, 0)),          # b1
                pl.BlockSpec((hp, cp), lambda i: (0, 0)),         # W2
                pl.BlockSpec((1, cp), lambda i: (0, 0)),          # b2
            ],
            out_specs=pl.BlockSpec((n_pad, cp), lambda i: (0, 0)),
            compiler_params=pltpu.CompilerParams(
                dimension_semantics=("arbitrary",),
                vmem_limit_bytes=vmem_limit),
            cost_estimate=pl.CostEstimate(
                flops=2 * n_pad * n_pad * (fp + hp)
                + 2 * n_pad * (fp * hp + hp * cp),
                transcendentals=n_pad * hp,
                bytes_accessed=fused_bytes),
        )(ahat_p, x_p, w1_p, b1_p, w2_p, b2_p)
        return out[:n, :c]

    # ---------------- K-tiled path ---------------- #
    n128 = _round_up(n, LANE)
    tm = min(row_tile, max(LANE, (n128 // 2) // LANE * LANE))  # >=2 row steps
    tk = tm
    n_pad = _round_up(n, tm)
    grid = (n_pad // tm, n_pad // tk)

    ahat_p = _pad2(ahat, n_pad, n_pad, jnp.bfloat16)
    x_p = _pad2(x, n_pad, fp, jnp.bfloat16)

    # Per-step VMEM: 2 bufs x (Ahat + X/H block) + resident W/b + acc + out.
    step_bytes = (2 * (2 * tm * tk + 2 * tk * max(fp, hp))
                  + 2 * fp * hp + 2 * hp * cp + 4 * (hp + cp)
                  + 4 * tm * max(fp, hp)
                  + 2 * (2 * tm * hp + 4 * tm * cp))
    vmem_limit = int(min(cap, max(2 * step_bytes, 32 * 1024 * 1024)))
    params = pltpu.CompilerParams(
        dimension_semantics=("parallel", "arbitrary"),
        vmem_limit_bytes=vmem_limit)

    h = pl.pallas_call(
        gcn_layer1_tiled_kernel,
        out_shape=jax.ShapeDtypeStruct((n_pad, hp), jnp.bfloat16),
        grid=grid,
        in_specs=[
            pl.BlockSpec((tm, tk), lambda i, k: (i, k)),   # Ahat block
            pl.BlockSpec((tk, fp), lambda i, k: (k, 0)),   # X block
            pl.BlockSpec((fp, hp), lambda i, k: (0, 0)),   # W1 (resident)
            pl.BlockSpec((1, hp), lambda i, k: (0, 0)),    # b1
        ],
        out_specs=pl.BlockSpec((tm, hp), lambda i, k: (i, 0)),
        scratch_shapes=[pltpu.VMEM((tm, fp), jnp.float32)],
        compiler_params=params,
        cost_estimate=pl.CostEstimate(
            flops=2 * n_pad * n_pad * fp + 2 * n_pad * fp * hp,
            transcendentals=n_pad * hp,
            bytes_accessed=2 * n_pad * n_pad + 2 * n_pad * fp
            + 2 * fp * hp + 4 * hp + 2 * n_pad * hp),
    )(ahat_p, x_p, w1_p, b1_p)

    out = pl.pallas_call(
        gcn_layer2_tiled_kernel,
        out_shape=jax.ShapeDtypeStruct((n_pad, cp), jnp.float32),
        grid=grid,
        in_specs=[
            pl.BlockSpec((tm, tk), lambda i, k: (i, k)),   # Ahat block
            pl.BlockSpec((tk, hp), lambda i, k: (k, 0)),   # H block
            pl.BlockSpec((hp, cp), lambda i, k: (0, 0)),   # W2 (resident)
            pl.BlockSpec((1, cp), lambda i, k: (0, 0)),    # b2
        ],
        out_specs=pl.BlockSpec((tm, cp), lambda i, k: (i, 0)),
        scratch_shapes=[pltpu.VMEM((tm, hp), jnp.float32)],
        compiler_params=params,
        cost_estimate=pl.CostEstimate(
            flops=2 * n_pad * n_pad * hp + 2 * n_pad * hp * cp,
            transcendentals=0,
            bytes_accessed=2 * n_pad * n_pad + 2 * n_pad * hp
            + 2 * hp * cp + 4 * cp + 4 * n_pad * cp),
    )(ahat_p, h, w2_p, b2_p)

    return out[:n, :c]


def build_normalized_adjacency(src, dst, num_nodes, *, n_pad=None,
                               dtype=jnp.bfloat16):
    """Dense Ahat = D_in^-1/2 A^T D_out^-1/2 with reverse edges added.

    Built directly at the (optionally padded) size and target MXU dtype so the
    forward wrapper does not have to materialize a second padded copy.
    Edge multiplicity is preserved (matches dgl.add_reverse_edges + GraphConv
    message sums); degrees are clamped to >= 1.
    TODO(synk): DGL raises for zero-in-degree nodes (allow_zero_in_degree=False);
    here isolated nodes are silently clamped instead.
    """
    if n_pad is None:
        n_pad = num_nodes
    a = jnp.zeros((n_pad, n_pad), jnp.float32)
    a = a.at[src, dst].add(1.0)
    a = a + a.T
    out_deg = jnp.clip(a.sum(axis=1), 1.0, None)
    in_deg = jnp.clip(a.sum(axis=0), 1.0, None)
    ahat = jax.lax.rsqrt(in_deg)[:, None] * a.T * jax.lax.rsqrt(out_deg)[None, :]
    return ahat.astype(dtype)


if __name__ == "__main__":
    def glorot(k, shape):
        fan_in, fan_out = shape
        limit = jnp.sqrt(6.0 / (fan_in + fan_out))
        return jax.random.uniform(k, shape, jnp.float32, -limit, limit)

    def reference(ahat_f32, x, w1, b1, w2, b2, bf16):
        if bf16:  # operand-matched reference (same casts the kernel uses)
            a = ahat_f32.astype(jnp.bfloat16)
            ax = jnp.dot(a, x.astype(jnp.bfloat16),
                         preferred_element_type=jnp.float32)
            h = jnp.dot(ax.astype(jnp.bfloat16), w1.astype(jnp.bfloat16),
                        preferred_element_type=jnp.float32) + b1
            h = _elu(h)
            ah = jnp.dot(a, h.astype(jnp.bfloat16),
                         preferred_element_type=jnp.float32)
            return jnp.dot(ah.astype(jnp.bfloat16), w2.astype(jnp.bfloat16),
                           preferred_element_type=jnp.float32) + b2
        h = _elu(ahat_f32 @ (x @ w1) + b1)
        return ahat_f32 @ (h @ w2) + b2

    def run_case(seed, num_nodes, num_edges, num_features, hidden, num_classes,
                 fused):
        ks = jax.random.split(jax.random.PRNGKey(seed), 4)
        edges = jax.random.randint(ks[0], (2, num_edges), 0, num_nodes)
        ahat_f32 = build_normalized_adjacency(edges[0], edges[1], num_nodes,
                                              dtype=jnp.float32)
        ahat_bf16 = ahat_f32.astype(jnp.bfloat16)  # what the kernel consumes
        x = jax.random.normal(ks[1], (num_nodes, num_features), jnp.float32)
        w1 = glorot(ks[2], (num_features, hidden))
        b1 = jnp.zeros((hidden,), jnp.float32)
        w2 = glorot(ks[3], (hidden, num_classes))
        b2 = jnp.zeros((num_classes,), jnp.float32)

        out = gcn_forward(ahat_bf16, x, w1, b1, w2, b2, fused=fused)
        jax.block_until_ready(out)
        assert out.shape == (num_nodes, num_classes)

        # Tight check against the bf16-operand-matched reference.
        ref_bf = reference(ahat_f32, x, w1, b1, w2, b2, bf16=True)
        assert jnp.allclose(out, ref_bf, atol=5e-3, rtol=5e-3), \
            f"bf16-matched mismatch (fused={fused})"
        # Loose check against full f32 semantics (bf16 operands intentional).
        ref_f32 = reference(ahat_f32, x, w1, b1, w2, b2, bf16=False)
        assert jnp.allclose(out, ref_f32, atol=7e-2, rtol=7e-2), \
            f"f32 reference mismatch (fused={fused})"

    # Module-scale test (GraphConv(num_features->16), GraphConv(16->4)):
    # tiny graph -> fused single-kernel path.
    run_case(seed=0, num_nodes=32, num_edges=64, num_features=8,
             hidden=16, num_classes=4, fused=None)

    # Force the K-tiled two-kernel path (grid=(2,2)) to exercise scaling code.
    run_case(seed=1, num_nodes=256, num_edges=512, num_features=8,
             hidden=16, num_classes=4, fused=False)

    print("KERNEL_OK")
</pallas_src>

<mosaic_0001>
module attributes {stable_mosaic.version = 11 : i64} {
  func.func @gcn_fused_kernel(%arg0: i32, %arg1: memref<32x32xbf16, #tpu.memory_space<vmem>>, %arg2: memref<32x128xbf16, #tpu.memory_space<vmem>>, %arg3: memref<128x128xbf16, #tpu.memory_space<vmem>>, %arg4: memref<1x128xf32, #tpu.memory_space<vmem>>, %arg5: memref<128x128xbf16, #tpu.memory_space<vmem>>, %arg6: memref<1x128xf32, #tpu.memory_space<vmem>>, %arg7: memref<32x128xf32, #tpu.memory_space<vmem>>) attributes {dimension_semantics = [#tpu.dimension_semantics<arbitrary>], iteration_bounds = array<i64: 1>, scalar_prefetch = 0 : i64, scratch_operands = 0 : i64, tpu.core_type = #tpu.core_type<tc>, window_params = [{pipeline_mode = #tpu.pipeline_mode<synchronous>, transform_indices = @transform_0, window_bounds = array<i64: 32, 32>}, {pipeline_mode = #tpu.pipeline_mode<synchronous>, transform_indices = @transform_1, window_bounds = array<i64: 32, 128>}, {pipeline_mode = #tpu.pipeline_mode<synchronous>, transform_indices = @transform_2, window_bounds = array<i64: 128, 128>}, {pipeline_mode = #tpu.pipeline_mode<synchronous>, transform_indices = @transform_3, window_bounds = array<i64: 1, 128>}, {pipeline_mode = #tpu.pipeline_mode<synchronous>, transform_indices = @transform_4, window_bounds = array<i64: 128, 128>}, {pipeline_mode = #tpu.pipeline_mode<synchronous>, transform_indices = @transform_5, window_bounds = array<i64: 1, 128>}, {pipeline_mode = #tpu.pipeline_mode<synchronous>, transform_indices = @transform_6, window_bounds = array<i64: 32, 128>}]} {
    %c0 = arith.constant 0 : index
    %c0_0 = arith.constant 0 : index
    %0 = vector.load %arg1[%c0, %c0_0] : memref<32x32xbf16, #tpu.memory_space<vmem>>, vector<32x32xbf16>
    %c0_1 = arith.constant 0 : index
    %c0_2 = arith.constant 0 : index
    %1 = vector.load %arg2[%c0_1, %c0_2] : memref<32x128xbf16, #tpu.memory_space<vmem>>, vector<32x128xbf16>
    %cst = arith.constant dense<0.000000e+00> : vector<32x128xf32>
    %2 = tpu.matmul %0, %1, %cst {dimension_numbers = #tpu.dot_dimension_numbers<[1], [0], [0], [1], [0, 0, 1, 1], [], []>} : vector<32x32xbf16>, vector<32x128xbf16>, vector<32x128xf32> -> vector<32x128xf32>
    %3 = arith.truncf %2 : vector<32x128xf32> to vector<32x128xbf16>
    %c0_3 = arith.constant 0 : index
    %c0_4 = arith.constant 0 : index
    %4 = vector.load %arg3[%c0_3, %c0_4] : memref<128x128xbf16, #tpu.memory_space<vmem>>, vector<128x128xbf16>
    %cst_5 = arith.constant dense<0.000000e+00> : vector<32x128xf32>
    %5 = tpu.matmul %3, %4, %cst_5 {dimension_numbers = #tpu.dot_dimension_numbers<[1], [0], [0], [1], [0, 0, 1, 1], [], []>} : vector<32x128xbf16>, vector<128x128xbf16>, vector<32x128xf32> -> vector<32x128xf32>
    %c0_6 = arith.constant 0 : index
    %c0_7 = arith.constant 0 : index
    %6 = vector.load %arg4[%c0_6, %c0_7] : memref<1x128xf32, #tpu.memory_space<vmem>>, vector<1x128xf32>
    %7 = vector.broadcast %6 : vector<1x128xf32> to vector<32x128xf32>
    %8 = arith.addf %5, %7 : vector<32x128xf32>
    %cst_8 = arith.constant 0.000000e+00 : f32
    %9 = vector.broadcast %cst_8 : f32 to vector<32x128xf32>
    %10 = arith.cmpf ogt, %8, %9 : vector<32x128xf32>
    %cst_9 = arith.constant 0.000000e+00 : f32
    %11 = vector.broadcast %cst_9 : f32 to vector<32x128xf32>
    %12 = arith.minimumf %8, %11 : vector<32x128xf32>
    %13 = math.exp %12 : vector<32x128xf32>
    %cst_10 = arith.constant 1.000000e+00 : f32
    %14 = vector.broadcast %cst_10 : f32 to vector<32x128xf32>
    %15 = arith.subf %13, %14 : vector<32x128xf32>
    %16 = arith.select %10, %8, %15 : vector<32x128xi1>, vector<32x128xf32>
    %17 = arith.truncf %16 : vector<32x128xf32> to vector<32x128xbf16>
    %cst_11 = arith.constant dense<0.000000e+00> : vector<32x128xf32>
    %18 = tpu.matmul %0, %17, %cst_11 {dimension_numbers = #tpu.dot_dimension_numbers<[1], [0], [0], [1], [0, 0, 1, 1], [], []>} : vector<32x32xbf16>, vector<32x128xbf16>, vector<32x128xf32> -> vector<32x128xf32>
    %19 = arith.truncf %18 : vector<32x128xf32> to vector<32x128xbf16>
    %c0_12 = arith.constant 0 : index
    %c0_13 = arith.constant 0 : index
    %20 = vector.load %arg5[%c0_12, %c0_13] : memref<128x128xbf16, #tpu.memory_space<vmem>>, vector<128x128xbf16>
    %cst_14 = arith.constant dense<0.000000e+00> : vector<32x128xf32>
    %21 = tpu.matmul %19, %20, %cst_14 {dimension_numbers = #tpu.dot_dimension_numbers<[1], [0], [0], [1], [0, 0, 1, 1], [], []>} : vector<32x128xbf16>, vector<128x128xbf16>, vector<32x128xf32> -> vector<32x128xf32>
    %c0_15 = arith.constant 0 : index
    %c0_16 = arith.constant 0 : index
    %22 = vector.load %arg6[%c0_15, %c0_16] : memref<1x128xf32, #tpu.memory_space<vmem>>, vector<1x128xf32>
    %23 = vector.broadcast %22 : vector<1x128xf32> to vector<32x128xf32>
    %24 = arith.addf %21, %23 : vector<32x128xf32>
    %c0_17 = arith.constant 0 : index
    %c0_18 = arith.constant 0 : index
    %25 = vector.load %arg7[%c0_17, %c0_18] : memref<32x128xf32, #tpu.memory_space<vmem>>, vector<32x128xf32>
    tpu.vector_store %arg7[%c0_17, %c0_18], %24 {strides = array<i32>} : memref<32x128xf32, #tpu.memory_space<vmem>>, vector<32x128xf32>,
    return
  }
  func.func @transform_0(%arg0: i32) -> (i32, i32) {
    %c0_i32 = arith.constant 0 : i32
    %c0_i32_0 = arith.constant 0 : i32
    %c0_i32_1 = arith.constant 0 : i32
    return %c0_i32, %c0_i32_0 : i32, i32
  }
  func.func @transform_1(%arg0: i32) -> (i32, i32) {
    %c0_i32 = arith.constant 0 : i32
    %c0_i32_0 = arith.constant 0 : i32
    %c0_i32_1 = arith.constant 0 : i32
    return %c0_i32, %c0_i32_0 : i32, i32
  }
  func.func @transform_2(%arg0: i32) -> (i32, i32) {
    %c0_i32 = arith.constant 0 : i32
    %c0_i32_0 = arith.constant 0 : i32
    %c0_i32_1 = arith.constant 0 : i32
    return %c0_i32, %c0_i32_0 : i32, i32
  }
  func.func @transform_3(%arg0: i32) -> (i32, i32) {
    %c0_i32 = arith.constant 0 : i32
    %c0_i32_0 = arith.constant 0 : i32
    %c0_i32_1 = arith.constant 0 : i32
    return %c0_i32, %c0_i32_0 : i32, i32
  }
  func.func @transform_4(%arg0: i32) -> (i32, i32) {
    %c0_i32 = arith.constant 0 : i32
    %c0_i32_0 = arith.constant 0 : i32
    %c0_i32_1 = arith.constant 0 : i32
    return %c0_i32, %c0_i32_0 : i32, i32
  }
  func.func @transform_5(%arg0: i32) -> (i32, i32) {
    %c0_i32 = arith.constant 0 : i32
    %c0_i32_0 = arith.constant 0 : i32
    %c0_i32_1 = arith.constant 0 : i32
    return %c0_i32, %c0_i32_0 : i32, i32
  }
  func.func @transform_6(%arg0: i32) -> (i32, i32) {
    %c0_i32 = arith.constant 0 : i32
    %c0_i32_0 = arith.constant 0 : i32
    %c0_i32_1 = arith.constant 0 : i32
    return %c0_i32, %c0_i32_0 : i32, i32
  }
}

</mosaic_0001>

<bundles_post_ra>
// kernel: tpu_custom_call.1
= control target key start
LH: loop header
LB: loop body
LE: loop exit
PB: predicated region body
PF: predicated region fallthrough
CT: control target
= control target key end

     0   :  { %11 = vsyncpa [#allocation3], 0  ;;  %s921_s0 = inlined_call_operand.hbm [shape: bf16[32,32], index: 0, kind: input, shape index: {}]   ;;  %s922_s1 = inlined_call_operand.hbm [shape: bf16[32,128], index: 1, kind: input, shape index: {}]   ;;  %s923_s2 = inlined_call_operand.hbm [shape: bf16[128,128], index: 2, kind: input, shape index: {}]   ;;  %s924_s3 = inlined_call_operand.vmem [shape: f32[1,128], index: 3, kind: input, shape index: {}]   ;;  %s925_s4 = inlined_call_operand.hbm [shape: bf16[128,128], index: 4, kind: input, shape index: {}]   ;;  %s926_s5 = inlined_call_operand.vmem [shape: f32[1,128], index: 5, kind: input, shape index: {}]   ;;  %s927_s6 = inlined_call_operand.hbm [shape: f32[32,128], index: 6, kind: output, shape index: {}]  }
   0x1   :  { %12 = vsyncpa [#allocation6], 0 }
   0x2   :  { %13 = vsyncpa [#allocation9], 0 }
   0x3   :  { %14 = vsyncpa [#allocation4], 0  ;;  %s777_s21 = smov [#allocation5]   ;;  %s778_s23 = smov [#allocation2]  }
   0x4   :  { %s32_s22 = sshll.u32 %s777_s21, 4  ;;  %s20_s24 = sshll.u32 %s778_s23, 4  ;;  %s33_s22 = int_to_ptr.vmem [resolvable:$true] %s32_s22  ;;  %s821_s24 = int_to_ptr.vmem [resolvable:$true] %s20_s24 }
   0x5   :  { %s659_s27 = scalar_lea.hbm %s922_s1, 256 }
   0x6   :  { %p660_p0 = scmp.ne.s32.totalorder %s922_s1, %s659_s27  ;;  %p663_p1 = scmp.lt.u32.totalorder %s659_s27, %s922_s1 }
   0x8   :  { %p665_p2 = pnand %p663_p1, %p660_p0 }
   0xa   :  { %668 = shalt.err (!%p665_p2)
}
   0xb   :  { %s669_s8 = scalar_lea.vmem %s33_s22, 256  ;;  %p674_p4 = scmp.lt.s32.totalorder %s33_s22, %s33_s22 }
   0xc   :  { %p670_p3 = scmp.ne.s32.totalorder %s33_s22, %s669_s8  ;;  %p675_p5 = scmp.lt.s32.totalorder %s669_s8, %s669_s8 }
   0xe   :  { %p676_p6 = por %p675_p5, %p674_p4 }
  0x10   :  { %p677_p7 = pnand %p676_p6, %p670_p3 }
  0x12   :  { %680 = shalt.err (!%p677_p7)
}
  0x13   :  { %s779_s9 = smov 64   ;;  %s780_s10 = smov 4  }
  0x14   :  { %38 = dma.hbm_to_vmem [thread:$0]  %s922_s1, 256, %s33_s22, [#allocation6], %s779_s9, %s779_s9, %s780_s10  }
  0x15   :  { %s681_s15 = scalar_lea.hbm %s921_s0, 256 }
  0x16   :  { %p682_p8 = scmp.ne.s32.totalorder %s921_s0, %s681_s15  ;;  %p685_p9 = scmp.lt.u32.totalorder %s681_s15, %s921_s0 }
  0x18   :  { %p687_p10 = pnand %p685_p9, %p682_p8 }
  0x1a   :  { %690 = shalt.err (!%p687_p10)
}
  0x1b   :  { %s691_s20 = scalar_lea.vmem %s821_s24, 256  ;;  %p696_p12 = scmp.lt.s32.totalorder %s821_s24, %s821_s24 }
  0x1c   :  { %p692_p11 = scmp.ne.s32.totalorder %s821_s24, %s691_s20  ;;  %p697_p13 = scmp.lt.s32.totalorder %s691_s20, %s691_s20 }
  0x1e   :  { %p698_p0 = por %p697_p13, %p696_p12 }
  0x20   :  { %p699_p1 = pnand %p698_p0, %p692_p11 }
  0x22   :  { %702 = shalt.err (!%p699_p1)
}
  0x23   :  { %26 = dma.hbm_to_vmem [thread:$0]  %s921_s0, 256, %s821_s24, [#allocation3], %s779_s9, %s779_s9, %s780_s10  }
  0x24   :  { %s781_s22 = smov [#allocation7]   ;;  %s782_s25 = smov [#allocation8]  }
  0x25   :  { %s44_s23 = sshll.u32 %s781_s22, 4  ;;  %s58_s26 = sshll.u32 %s782_s25, 4  ;;  %s45_s23 = int_to_ptr.vmem [resolvable:$true] %s44_s23  ;;  %s858_s26 = int_to_ptr.vmem [resolvable:$true] %s58_s26 }
  0x26   :  { %s703_s29 = scalar_lea.hbm %s923_s2, 1024 }
  0x27   :  { %p704_p2 = scmp.ne.s32.totalorder %s923_s2, %s703_s29  ;;  %p707_p3 = scmp.lt.u32.totalorder %s703_s29, %s923_s2 }
  0x29   :  { %p709_p4 = pnand %p707_p3, %p704_p2 }
  0x2b   :  { %712 = shalt.err (!%p709_p4)
}
  0x2c   :  { %s713_s0 = scalar_lea.vmem %s45_s23, 1024  ;;  %p718_p6 = scmp.lt.s32.totalorder %s45_s23, %s45_s23 }
  0x2d   :  { %p714_p5 = scmp.ne.s32.totalorder %s45_s23, %s713_s0  ;;  %p719_p7 = scmp.lt.s32.totalorder %s713_s0, %s713_s0 }
  0x2f   :  { %p720_p8 = por %p719_p7, %p718_p6 }
  0x31   :  { %p721_p9 = pnand %p720_p8, %p714_p5 }
  0x33   :  { %724 = shalt.err (!%p721_p9)
}
  0x34   :  { %50 = dma.hbm_to_vmem [thread:$0]  %s923_s2, 1024, %s45_s23, [#allocation6], %s779_s9, %s779_s9, %s780_s10  }
  0x35   :  { %s725_s15 = scalar_lea.hbm %s925_s4, 1024 }
  0x36   :  { %p726_p10 = scmp.ne.s32.totalorder %s925_s4, %s725_s15  ;;  %p729_p11 = scmp.lt.u32.totalorder %s725_s15, %s925_s4 }
  0x38   :  { %p731_p12 = pnand %p729_p11, %p726_p10 }
  0x3a   :  { %734 = shalt.err (!%p731_p12)
}
  0x3b   :  { %s735_s20 = scalar_lea.vmem %s858_s26, 1024  ;;  %p740_p0 = scmp.lt.s32.totalorder %s858_s26, %s858_s26 }
  0x3c   :  { %p736_p13 = scmp.ne.s32.totalorder %s858_s26, %s735_s20  ;;  %p741_p1 = scmp.lt.s32.totalorder %s735_s20, %s735_s20 }
  0x3e   :  { %p742_p2 = por %p741_p1, %p740_p0 }
  0x40   :  { %p743_p3 = pnand %p742_p2, %p736_p13 }
  0x42   :  { %746 = shalt.err (!%p743_p3)
}
  0x43   :  { %64 = dma.hbm_to_vmem [thread:$0]  %s925_s4, 1024, %s858_s26, [#allocation9], %s779_s9, %s779_s9, %s780_s10  }
  0x44   :  { %769 = dma.done.wait [#allocation3], 256  }
  0x45   :  { %770 = vsyncadd [#allocation3], 4294967040 }
  0x46   :  { %771 = dma.done.wait [#allocation6], 1280  }
  0x47   :  { %772 = vsyncadd [#allocation6], 4294966016 }
  0x48   :  { %773 = dma.done.wait [#allocation9], 1024  }
  0x49   :  { %774 = vsyncadd [#allocation9], 4294966272  ;;  %v631_v0 = vld [vmem:[#allocation5] sm:$0xff]   ;;  %v632_v1 = vld [vmem:[#allocation5 + $0x8] sm:$0xff]   ;;  %vm110_vm0 = vcmask 261120   ;;  %s783_s21 = smov [#allocation10]  }
  0x4a   :  { %566 = vmatprep.subr.bf16.mxu1 %v631_v0  ;;  %v633_v2 = vld [vmem:[#allocation2] sm:$0xff]   ;;  %v897_v4 = vld [vmem:[#allocation2 + $0x8] sm:$0xff]   ;;  %v637_v6 = vld [vmem:[#allocation7 + $0x10] sm:$0xff]   ;;  %s494_s22 = sshll.u32 %s783_s21, 4  ;;  %s495_s22 = int_to_ptr.vmem [resolvable:$true] %s494_s22 }
  0x4b   :  { %567 = vmatpush3.bf16.msra.mxu1 %v631_v0  ;;  %570 = vmatprep.mubr.msk.bf16.mxu1 %vm110_vm0, %v633_v2  ;;  %v635_v3 = vld [vmem:[#allocation7] sm:$0xff]   ;;  %v636_v5 = vld [vmem:[#allocation7 + $0x8] sm:$0xff]   ;;  %v638_v7 = vld [vmem:[#allocation7 + $0x18] sm:$0xff]   ;;  %s747_s23 = scalar_lea.vmem %s495_s22, 512  ;;  %p752_p5 = scmp.lt.s32.totalorder %s495_s22, %s495_s22 }
  0x4c   :  { %568 = vmatprep.subr.bf16.mxu1 %v632_v1  ;;  %598 = vmatprep.mubr.msk.bf16.mxu0 %vm110_vm0, %v633_v2  ;;  %v639_v8 = vld [vmem:[#allocation7 + $0x20] sm:$0xff]   ;;  %v640_v9 = vld [vmem:[#allocation7 + $0x28] sm:$0xff]   ;;  %v641_v10 = vld [vmem:[#allocation7 + $0x30] sm:$0xff]   ;;  %p748_p4 = scmp.ne.s32.totalorder %s495_s22, %s747_s23  ;;  %p753_p6 = scmp.lt.s32.totalorder %s747_s23, %s747_s23 }
  0x4d   :  { %v642_v11 = vld [vmem:[#allocation7 + $0x38] sm:$0xff]   ;;  %v514_v18 = vld [vmem:[%s924_s3] ss:$0 sm:$0xff]  ;;  %v644_v50 = vld [vmem:[#allocation8 + $0x8] sm:$0xff]  }
  0x4e   :  { %v643_v49 = vld [vmem:[#allocation8] sm:$0xff]   ;;  %v645_v51 = vld [vmem:[#allocation8 + $0x10] sm:$0xff]   ;;  %v646_v52 = vld [vmem:[#allocation8 + $0x18] sm:$0xff]   ;;  %p754_p7 = por %p753_p6, %p752_p5 }
  0x4f   :  { %569 = vmatpush3.bf16.msra.mxu1 %v632_v1  ;;  %v647_v53 = vld [vmem:[#allocation8 + $0x20] sm:$0xff]   ;;  %v648_v54 = vld [vmem:[#allocation8 + $0x28] sm:$0xff]   ;;  %v649_v55 = vld [vmem:[#allocation8 + $0x30] sm:$0xff]  }
  0x50   :  { %574 = vmatprep.subr.bf16.mxu1 %v635_v3  ;;  %v650_v56 = vld [vmem:[#allocation8 + $0x38] sm:$0xff]   ;;  %v529_v63 = vld [vmem:[%s926_s5] ss:$0 sm:$0xff]  ;;  %p755_p8 = pnand %p754_p7, %p748_p4 }
  0x52   :  { %571 = vmatmul.mubr.msk.bf16.vlgmr.msra.gmra.mrb[0].mxu1 %vm110_vm0, %v897_v4 }
  0x53   :  { %575 = vmatpush3.bf16.msra.mxu1 %v635_v3 }
  0x54   :  { %576 = vmatprep.subr.bf16.mxu1 %v636_v5 }
  0x57   :  { %577 = vmatpush3.bf16.msra.mxu1 %v636_v5 }
  0x58   :  { %578 = vmatprep.subr.bf16.mxu1 %v637_v6 }
  0x5b   :  { %579 = vmatpush3.bf16.msra.mxu1 %v637_v6 }
  0x5c   :  { %580 = vmatprep.subr.bf16.mxu1 %v638_v7 }
  0x5f   :  { %581 = vmatpush3.bf16.msra.mxu1 %v638_v7 }
  0x60   :  { %582 = vmatprep.subr.bf16.mxu1 %v639_v8 }
  0x63   :  { %583 = vmatpush3.bf16.msra.mxu1 %v639_v8 }
  0x64   :  { %584 = vmatprep.subr.bf16.mxu1 %v640_v9 }
  0x67   :  { %585 = vmatpush3.bf16.msra.mxu1 %v640_v9 }
  0x68   :  { %586 = vmatprep.subr.bf16.mxu1 %v641_v10 }
  0x6b   :  { %587 = vmatpush3.bf16.msra.mxu1 %v641_v10 }
  0x6c   :  { %588 = vmatprep.subr.bf16.mxu1 %v642_v11 }
  0x6f   :  { %589 = vmatpush3.bf16.msra.mxu1 %v642_v11 }
 0x125   :  { %v572_v12 = vpop.f32.mrb[0].mxu1 }
 0x126   :  { %v151_v13 = vpop.f32.mrb[1].mxu1 }
 0x127   :  { %v573_v14 = vpop.f32.mrb[2].mxu1 }
 0x128   :  { %v167_v15 = vpack.c.bf16 %v573_v14, %v572_v12  ;;  %v154_v16 = vpop.f32.mrb[3].mxu1 }
 0x129   :  { %v166_v17 = vpack.c.bf16 %v154_v16, %v151_v13 }
 0x12b   :  { %590 = vmatprep.mubr.bf16.mxu1 %v166_v17 }
 0x12c   :  { %591 = vmatmul.mubr.bf16.vlgmr.msra.gmra.mrb[4].mxu1 %v167_v15 }
 0x1ff   :  { %v592_v19 = vpop.f32.mrb[4].mxu1 }
 0x200   :  { %v282_v20 = vadd.f32 %v592_v19, %v514_v18  ;;  %v273_v21 = vpop.f32.mrb[5].mxu1 }
 0x201   :  { %v274_v22 = vadd.f32 %v514_v18, %v273_v21  ;;  %v593_v23 = vpop.f32.mrb[6].mxu1 }
 0x202   :  { %v294_v24 = vmin.f32 %v282_v20, 0.0  ;;  %v285_v25 = vadd.f32 %v593_v23, %v514_v18  ;;  %v276_v26 = vpop.f32.mrb[7].mxu1  ;;  %vm290_vm1 = vcmp.gt.f32.partialorder %v282_v20, 0.0 }
 0x203   :  { %v292_v27 = vmin.f32 %v274_v22, 0.0  ;;  %v277_v28 = vadd.f32 %v514_v18, %v276_v26  ;;  %vm288_vm3 = vcmp.gt.f32.partialorder %v274_v22, 0.0 }
 0x204   :  { %v300_v29 = vmul.f32 1.442695, %v294_v24  ;;  %v295_v30 = vmin.f32 %v285_v25, 0.0  ;;  %vm291_vm2 = vcmp.gt.f32.partialorder %v285_v25, 0.0 }
 0x205   :  { %v296_v31 = vmul.f32 1.442695, %v292_v27  ;;  %v293_v32 = vmin.f32 %v277_v28, 0.0  ;;  %vm289_vm4 = vcmp.gt.f32.partialorder %v277_v28, 0.0 }
 0x206   :  { %651 = vpow2.f32 %v300_v29  ;;  %v302_v33 = vmul.f32 1.442695, %v295_v30 }
 0x207   :  { %653 = vpow2.f32 %v296_v31  ;;  %v298_v34 = vmul.f32 1.442695, %v293_v32 }
 0x208   :  { %655 = vpow2.f32 %v302_v33 }
 0x209   :  { %657 = vpow2.f32 %v298_v34 }
 0x210   :  { %v652_v35 = vpop.eup %651 }
 0x211   :  { %v654_v36 = vpop.eup %653  ;;  %v525_v37 = vadd.f32 -1.0, %v652_v35 }
 0x212   :  { %v656_v38 = vpop.eup %655  ;;  %v523_v39 = vadd.f32 -1.0, %v654_v36 }
 0x213   :  { %v658_v40 = vpop.eup %657  ;;  %v526_v41 = vadd.f32 -1.0, %v656_v38  ;;  %v310_v43 = vsel %vm290_vm1, %v282_v20, %v525_v37 }
 0x214   :  { %v524_v42 = vadd.f32 -1.0, %v658_v40  ;;  %v308_v45 = vsel %vm288_vm3, %v274_v22, %v523_v39 }
 0x215   :  { %v311_v44 = vsel %vm291_vm2, %v285_v25, %v526_v41 }
 0x216   :  { %v309_v46 = vsel %vm289_vm4, %v277_v28, %v524_v42  ;;  %v313_v47 = vpack.c.bf16 %v311_v44, %v310_v43 }
 0x217   :  { %v312_v48 = vpack.c.bf16 %v309_v46, %v308_v45 }
 0x219   :  { %594 = vmatprep.subr.bf16.mxu0 %v312_v48 }
 0x21a   :  { %595 = vmatpush3.bf16.msra.mxu0 %v312_v48 }
 0x21b   :  { %596 = vmatprep.subr.bf16.mxu0 %v313_v47 }
 0x21e   :  { %597 = vmatpush3.bf16.msra.mxu0 %v313_v47 }
 0x21f   :  { %602 = vmatprep.subr.bf16.mxu0 %v643_v49 }
 0x221   :  { %599 = vmatmul.mubr.msk.bf16.vlgmr.msra.gmra.mrb[0].mxu0 %vm110_vm0, %v897_v4 }
 0x222   :  { %603 = vmatpush3.bf16.msra.mxu0 %v643_v49 }
 0x223   :  { %604 = vmatprep.subr.bf16.mxu0 %v644_v50 }
 0x226   :  { %605 = vmatpush3.bf16.msra.mxu0 %v644_v50 }
 0x227   :  { %606 = vmatprep.subr.bf16.mxu0 %v645_v51 }
 0x22a   :  { %607 = vmatpush3.bf16.msra.mxu0 %v645_v51 }
 0x22b   :  { %608 = vmatprep.subr.bf16.mxu0 %v646_v52 }
 0x22e   :  { %609 = vmatpush3.bf16.msra.mxu0 %v646_v52 }
 0x22f   :  { %610 = vmatprep.subr.bf16.mxu0 %v647_v53 }
 0x232   :  { %611 = vmatpush3.bf16.msra.mxu0 %v647_v53 }
 0x233   :  { %612 = vmatprep.subr.bf16.mxu0 %v648_v54 }
 0x236   :  { %613 = vmatpush3.bf16.msra.mxu0 %v648_v54 }
 0x237   :  { %614 = vmatprep.subr.bf16.mxu0 %v649_v55 }
 0x23a   :  { %615 = vmatpush3.bf16.msra.mxu0 %v649_v55 }
 0x23b   :  { %616 = vmatprep.subr.bf16.mxu0 %v650_v56 }
 0x23e   :  { %617 = vmatpush3.bf16.msra.mxu0 %v650_v56 }
 0x2f4   :  { %v600_v57 = vpop.f32.mrb[0].mxu0 }
 0x2f5   :  { %v348_v58 = vpop.f32.mrb[1].mxu0 }
 0x2f6   :  { %v601_v59 = vpop.f32.mrb[2].mxu0 }
 0x2f7   :  { %v364_v60 = vpack.c.bf16 %v601_v59, %v600_v57  ;;  %v351_v61 = vpop.f32.mrb[3].mxu0 }
 0x2f8   :  { %v363_v62 = vpack.c.bf16 %v351_v61, %v348_v58 }
 0x2fa   :  { %618 = vmatprep.mubr.bf16.mxu0 %v363_v62 }
 0x2fb   :  { %619 = vmatmul.mubr.bf16.vlgmr.msra.gmra.mrb[4].mxu0 %v364_v60 }
 0x3ce   :  { %v620_v0 = vpop.f32.mrb[4].mxu0 }
 0x3cf   :  { %v479_v1 = vadd.f32 %v620_v0, %v529_v63  ;;  %v470_v2 = vpop.f32.mrb[5].mxu0 }
 0x3d0   :  { %v471_v3 = vadd.f32 %v529_v63, %v470_v2  ;;  %v621_v4 = vpop.f32.mrb[6].mxu0 }
 0x3d1   :  { %487 = vst [vmem:[#allocation10 + $0x10] sm:$0xff] %v479_v1  ;;  %v482_v5 = vadd.f32 %v621_v4, %v529_v63  ;;  %v473_v6 = vpop.f32.mrb[7].mxu0 }
 0x3d2   :  { %485 = vst [vmem:[#allocation10] sm:$0xff] %v471_v3  ;;  %v474_v7 = vadd.f32 %v529_v63, %v473_v6 }
 0x3d3   :  { %488 = vst [vmem:[#allocation10 + $0x18] sm:$0xff] %v482_v5 }
 0x3d4   :  { %486 = vst [vmem:[#allocation10 + $0x8] sm:$0xff] %v474_v7 }
 0x3d5   :  { %758 = shalt.err (!%p755_p8)
}
 0x3d6   :  { %s759_s26 = scalar_lea.hbm %s927_s6, 512 }
 0x3d7   :  { %p760_p9 = scmp.ne.s32.totalorder %s927_s6, %s759_s26  ;;  %p763_p10 = scmp.lt.u32.totalorder %s759_s26, %s927_s6 }
 0x3d9   :  { %p765_p11 = pnand %p763_p10, %p760_p9 }
 0x3db   :  { %768 = shalt.err (!%p765_p11)
}
 0x3dc   :  { %s784_s7 = smov 128   ;;  %s785_s8 = smov 8  }
 0x3dd   :  { %500 = dma.vmem_to_hbm [thread:$0]  %s495_s22, 512, %s927_s6, [#allocation4], %s784_s7, %s784_s7, %s785_s8  }
 0x3de   :  { %775 = dma.done.wait [#allocation4], 512  }
 0x3df   :  { %776 = vsyncadd [#allocation4], 4294966784 }
 0x3e0   :  { %504 = vsyncpa [#allocation3], 1 }
 0x3e1   :  { %505 = vsyncpa [#allocation6], 1 }
 0x3e2   :  { %506 = vsyncpa [#allocation9], 1 }
 0x3e3   :  { %507 = vsyncpa [#allocation4], 1 }

</bundles_post_ra>
